<compile_context>
chip_gen: v6e
topology: v6e:2x2x1
jax: 0.10.0
libtpu: 0.0.40
codegen_flags: <defaults>
</compile_context>

<pallas_src>
import functools

import jax
import jax.numpy as jnp
import numpy as np
from jax.experimental import pallas as pl
from jax.experimental.pallas import tpu as pltpu


def _se_kernel(x_ref, w1t_ref, b1_ref, w2_ref, b2_ref, o_ref, *, inv_hw):
    # x_ref: (bt, C, HWp) — HW lane-dense, C on the sublane axis.
    x = x_ref[...]                                   # native dtype; never upcast the tile

    # Global average pool over the spatial (lane) axis.  f32 accumulation;
    # zero lane-padding contributes nothing, divide by the true H*W.
    p = jnp.sum(x, axis=2, keepdims=True, dtype=jnp.float32) * inv_hw    # (bt, C, 1)

    # 1x1 conv #1 (C -> hid): broadcast-multiply + cross-sublane reduce.
    # Intentionally NOT on the MXU — (C x hid) is far below MXU granularity.
    h = jnp.sum(w1t_ref[...][None, :, :] * p, axis=1, keepdims=True)     # (bt, 1, hid)
    h = jnp.maximum(h + b1_ref[...], 0.0)                                # ReLU

    # 1x1 conv #2 (hid -> C): broadcast-multiply + lane reduce.
    s = jnp.sum(w2_ref[...][None, :, :] * h, axis=2, keepdims=True)      # (bt, C, 1)
    s = s + b2_ref[...]

    scale = jnp.exp(jax.nn.sigmoid(s))                                   # (bt, C, 1) — EUP

    # Apply in the input's native dtype (no full-tile f32 materialization).
    o_ref[...] = x * scale.astype(o_ref.dtype)                           # lane-broadcast mul


def _num_tensorcores_per_chip():
    """2 on v7x (dual TensorCore), else 1.  Conservative fallback: 1."""
    try:
        kind = jax.devices()[0].device_kind.lower()
    except Exception:
        return 1
    return 2 if "7" in kind else 1


def _pick_batch_tile(B, per_batch_bytes, num_tc):
    """Largest divisor of B whose double-buffered in+out block fits the budget,
    while keeping at least one grid step per TensorCore (v7x)."""
    budget = 24 * 1024 * 1024   # ~24 MiB for 2 dirs x 2 buffers, all generations
    best = 1
    for bt in range(1, B + 1):
        if B % bt:
            continue
        if (B // bt) < num_tc:          # keep >= num_tc "parallel" steps
            continue
        if 4 * bt * per_batch_bytes <= budget:
            best = bt
    return best


def se_block(x, params, *, batch_tile=None, donate_input=False):
    """SEBlock forward for NCHW input `x` with params {'w1','b1','w2','b2'}.

    Activations stream in x.dtype (pass bf16 for half the HBM traffic); the
    squeeze math is always accumulated in f32.
    """
    B, C, H, W = x.shape
    hid = params['w1'].shape[0]
    HW = H * W
    HW_pad = -(-HW // 128) * 128        # lane-dense: unmasked stores, contiguous DMA

    # Lane-dense layout: fold spatial dims into one H*W lane axis (+ pad).
    x2 = x.reshape(B, C, HW)
    if HW_pad != HW:
        x2 = jnp.pad(x2, ((0, 0), (0, 0), (0, HW_pad - HW)))

    per_batch_bytes = C * HW_pad * x2.dtype.itemsize
    num_tc = _num_tensorcores_per_chip()
    if batch_tile is None:
        batch_tile = _pick_batch_tile(B, per_batch_bytes, num_tc)
    assert B % batch_tile == 0, "batch_tile must divide the batch size"

    w1t = jnp.transpose(params['w1']).astype(jnp.float32)   # (C, hid)
    b1 = params['b1'][None, :].astype(jnp.float32)          # (1, hid)
    w2 = params['w2'].astype(jnp.float32)                   # (C, hid)
    b2 = params['b2'][:, None].astype(jnp.float32)          # (C, 1)

    # Scoped-VMEM budget: double-buffered in+out blocks + resident weights,
    # with headroom; at least 32 MiB (v5e's default is only 16 MiB), capped at
    # v7x's 64 MiB physical VMEM per TensorCore.
    block_bytes = 4 * batch_tile * per_batch_bytes
    weight_bytes = 4 * (2 * C * hid + hid + C)
    vmem_limit = int(1.25 * block_bytes) + weight_bytes + (2 << 20)
    vmem_limit = min(64 << 20, max(32 << 20, vmem_limit))

    kernel = functools.partial(_se_kernel, inv_hw=1.0 / HW)

    out = pl.pallas_call(
        kernel,
        out_shape=jax.ShapeDtypeStruct((B, C, HW_pad), x.dtype),
        grid_spec=pltpu.PrefetchScalarGridSpec(
            num_scalar_prefetch=0,
            grid=(B // batch_tile,),
            in_specs=[
                pl.BlockSpec((batch_tile, C, HW_pad), lambda g: (g, 0, 0)),  # x (lane-dense)
                pl.BlockSpec((C, hid), lambda g: (0, 0)),                    # W1^T
                pl.BlockSpec((1, hid), lambda g: (0, 0)),                    # b1
                pl.BlockSpec((C, hid), lambda g: (0, 0)),                    # W2
                pl.BlockSpec((C, 1), lambda g: (0, 0)),                      # b2
            ],
            out_specs=pl.BlockSpec((batch_tile, C, HW_pad), lambda g: (g, 0, 0)),
        ),
        compiler_params=pltpu.CompilerParams(
            dimension_semantics=("parallel",),
            vmem_limit_bytes=vmem_limit),
        input_output_aliases=({0: 0} if donate_input else {}),
    )(x2, w1t, b1, w2, b2)

    if HW_pad != HW:
        out = out[:, :, :HW]
    return out.reshape(B, C, H, W)


def se_block_reference(x, params):
    """Pure-JAX reference mirroring the PyTorch SEBlock forward."""
    p = jnp.mean(x, axis=(2, 3), keepdims=True)                               # (B,C,1,1)
    h = jnp.einsum('hc,bcij->bhij', params['w1'], p) + params['b1'][None, :, None, None]
    h = jax.nn.relu(h)
    s = jnp.einsum('ch,bhij->bcij', params['w2'], h) + params['b2'][None, :, None, None]
    return x * jnp.exp(jax.nn.sigmoid(s))


if __name__ == "__main__":
    B, C, H, W = 2, 64, 16, 16
    reduct_ratio = 16                 # module default
    hid = C // reduct_ratio

    key = jax.random.PRNGKey(0)
    ks = jax.random.split(key, 6)

    # Deterministic synthetic parameters (shapes from SEBlock.__init__,
    # 1x1 conv weights flattened to matrices).
    params = {
        'w1': 0.2 * jax.random.normal(ks[0], (hid, C), jnp.float32),   # linear1 weight
        'b1': 0.1 * jax.random.normal(ks[1], (hid,), jnp.float32),     # linear1 bias
        'w2': 0.2 * jax.random.normal(ks[2], (C, hid), jnp.float32),   # linear2 weight
        'b2': 0.1 * jax.random.normal(ks[3], (C,), jnp.float32),       # linear2 bias
    }
    x = jax.random.normal(ks[4], (B, C, H, W), jnp.float32)
    ref = se_block_reference(x, params)

    # 1) Auto-tuned batch_tile (merged on single-TC v5e/v6e, split on v7x).
    out_auto = jax.block_until_ready(se_block(x, params))
    np.testing.assert_allclose(np.asarray(out_auto), np.asarray(ref),
                               rtol=1e-4, atol=1e-4)

    # 2) Per-batch grid (maps 1:1 onto the two v7x TensorCores).
    out_par = jax.block_until_ready(se_block(x, params, batch_tile=1))
    np.testing.assert_allclose(np.asarray(out_par), np.asarray(ref),
                               rtol=1e-4, atol=1e-4)

    # 3) Fully merged single grid step (no per-step overhead on v5e/v6e).
    out_merged = jax.block_until_ready(se_block(x, params, batch_tile=B))
    np.testing.assert_allclose(np.asarray(out_merged), np.asarray(ref),
                               rtol=1e-4, atol=1e-4)

    # 4) Output aliased onto the input block (HBM-footprint relief when x is
    #    donated at the JAX level; still correct when it is not).
    out_alias = jax.block_until_ready(se_block(x + 0.0, params, donate_input=True))
    np.testing.assert_allclose(np.asarray(out_alias), np.asarray(ref),
                               rtol=1e-4, atol=1e-4)

    # 5) bf16 streaming path: half the HBM bytes, pool still accumulated in f32.
    x_bf = x.astype(jnp.bfloat16)
    ref_bf = se_block_reference(x_bf.astype(jnp.float32), params)
    out_bf = jax.block_until_ready(se_block(x_bf, params))
    assert out_bf.dtype == jnp.bfloat16
    np.testing.assert_allclose(np.asarray(out_bf.astype(jnp.float32)),
                               np.asarray(ref_bf), rtol=2e-2, atol=2e-2)

    # 6) Non-128-multiple spatial size (14x14=196 -> padded to 256 lanes).
    x_odd = jax.random.normal(ks[5], (B, C, 14, 14), jnp.float32)
    ref_odd = se_block_reference(x_odd, params)
    out_odd = jax.block_until_ready(se_block(x_odd, params))
    np.testing.assert_allclose(np.asarray(out_odd), np.asarray(ref_odd),
                               rtol=1e-4, atol=1e-4)

    print("KERNEL_OK")
</pallas_src>

<mosaic_0001>
module attributes {stable_mosaic.version = 11 : i64} {
  func.func @_se_kernel(%arg0: i32, %arg1: memref<2x64x256xf32, #tpu.memory_space<vmem>>, %arg2: memref<64x4xf32, #tpu.memory_space<vmem>>, %arg3: memref<1x4xf32, #tpu.memory_space<vmem>>, %arg4: memref<64x4xf32, #tpu.memory_space<vmem>>, %arg5: memref<64x1xf32, #tpu.memory_space<vmem>>, %arg6: memref<2x64x256xf32, #tpu.memory_space<vmem>>) attributes {dimension_semantics = [#tpu.dimension_semantics<parallel>], iteration_bounds = array<i64: 1>, scalar_prefetch = 0 : i64, scratch_operands = 0 : i64, tpu.core_type = #tpu.core_type<tc>, window_params = [{transform_indices = @transform_0, window_bounds = array<i64: 2, 64, 256>}, {pipeline_mode = #tpu.pipeline_mode<synchronous>, transform_indices = @transform_1, window_bounds = array<i64: 64, 4>}, {pipeline_mode = #tpu.pipeline_mode<synchronous>, transform_indices = @transform_2, window_bounds = array<i64: 1, 4>}, {pipeline_mode = #tpu.pipeline_mode<synchronous>, transform_indices = @transform_3, window_bounds = array<i64: 64, 4>}, {pipeline_mode = #tpu.pipeline_mode<synchronous>, transform_indices = @transform_4, window_bounds = array<i64: 64, 1>}, {transform_indices = @transform_5, window_bounds = array<i64: 2, 64, 256>}]} {
    %c0 = arith.constant 0 : index
    %c0_0 = arith.constant 0 : index
    %c0_1 = arith.constant 0 : index
    %0 = vector.load %arg1[%c0, %c0_0, %c0_1] : memref<2x64x256xf32, #tpu.memory_space<vmem>>, vector<2x64x256xf32>
    %cst = arith.constant dense<0.000000e+00> : vector<2x64xf32>
    %1 = vector.multi_reduction <add>, %0, %cst [2] : vector<2x64x256xf32> to vector<2x64xf32>
    %2 = vector.shape_cast %1 : vector<2x64xf32> to vector<2x64x1xf32>
    %cst_2 = arith.constant 3.906250e-03 : f32
    %3 = vector.broadcast %cst_2 : f32 to vector<2x64x1xf32>
    %4 = arith.mulf %2, %3 : vector<2x64x1xf32>
    %c0_3 = arith.constant 0 : index
    %c0_4 = arith.constant 0 : index
    %5 = vector.load %arg2[%c0_3, %c0_4] : memref<64x4xf32, #tpu.memory_space<vmem>>, vector<64x4xf32>
    %6 = vector.shape_cast %5 : vector<64x4xf32> to vector<1x64x4xf32>
    %7 = vector.broadcast %6 : vector<1x64x4xf32> to vector<2x64x4xf32>
    %8 = vector.broadcast %4 : vector<2x64x1xf32> to vector<2x64x4xf32>
    %9 = arith.mulf %7, %8 : vector<2x64x4xf32>
    %cst_5 = arith.constant dense<0.000000e+00> : vector<2x4xf32>
    %10 = vector.multi_reduction <add>, %9, %cst_5 [1] : vector<2x64x4xf32> to vector<2x4xf32>
    %11 = vector.shape_cast %10 : vector<2x4xf32> to vector<2x1x4xf32>
    %c0_6 = arith.constant 0 : index
    %c0_7 = arith.constant 0 : index
    %12 = vector.load %arg3[%c0_6, %c0_7] : memref<1x4xf32, #tpu.memory_space<vmem>>, vector<1x4xf32>
    %13 = vector.shape_cast %12 : vector<1x4xf32> to vector<1x1x4xf32>
    %14 = vector.broadcast %13 : vector<1x1x4xf32> to vector<2x1x4xf32>
    %15 = arith.addf %11, %14 : vector<2x1x4xf32>
    %cst_8 = arith.constant 0.000000e+00 : f32
    %16 = vector.broadcast %cst_8 : f32 to vector<2x1x4xf32>
    %17 = arith.maximumf %15, %16 : vector<2x1x4xf32>
    %c0_9 = arith.constant 0 : index
    %c0_10 = arith.constant 0 : index
    %18 = vector.load %arg4[%c0_9, %c0_10] : memref<64x4xf32, #tpu.memory_space<vmem>>, vector<64x4xf32>
    %19 = vector.shape_cast %18 : vector<64x4xf32> to vector<1x64x4xf32>
    %20 = vector.broadcast %19 : vector<1x64x4xf32> to vector<2x64x4xf32>
    %21 = vector.broadcast %17 : vector<2x1x4xf32> to vector<2x64x4xf32>
    %22 = arith.mulf %20, %21 : vector<2x64x4xf32>
    %cst_11 = arith.constant dense<0.000000e+00> : vector<2x64xf32>
    %23 = vector.multi_reduction <add>, %22, %cst_11 [2] : vector<2x64x4xf32> to vector<2x64xf32>
    %24 = vector.shape_cast %23 : vector<2x64xf32> to vector<2x64x1xf32>
    %c0_12 = arith.constant 0 : index
    %c0_13 = arith.constant 0 : index
    %25 = vector.load %arg5[%c0_12, %c0_13] : memref<64x1xf32, #tpu.memory_space<vmem>>, vector<64x1xf32>
    %26 = vector.shape_cast %25 : vector<64x1xf32> to vector<1x64x1xf32>
    %27 = vector.broadcast %26 : vector<1x64x1xf32> to vector<2x64x1xf32>
    %28 = arith.addf %24, %27 : vector<2x64x1xf32>
    %29 = arith.negf %28 : vector<2x64x1xf32>
    %30 = math.exp %29 : vector<2x64x1xf32>
    %cst_14 = arith.constant 1.000000e+00 : f32
    %31 = vector.broadcast %cst_14 : f32 to vector<2x64x1xf32>
    %32 = arith.addf %31, %30 : vector<2x64x1xf32>
    %33 = arith.divf %31, %32 : vector<2x64x1xf32>
    %34 = math.exp %33 : vector<2x64x1xf32>
    %35 = vector.broadcast %34 : vector<2x64x1xf32> to vector<2x64x256xf32>
    %36 = arith.mulf %0, %35 : vector<2x64x256xf32>
    %c0_15 = arith.constant 0 : index
    %c0_16 = arith.constant 0 : index
    %c0_17 = arith.constant 0 : index
    %37 = vector.load %arg6[%c0_15, %c0_16, %c0_17] : memref<2x64x256xf32, #tpu.memory_space<vmem>>, vector<2x64x256xf32>
    tpu.vector_store %arg6[%c0_15, %c0_16, %c0_17], %36 {strides = array<i32>} : memref<2x64x256xf32, #tpu.memory_space<vmem>>, vector<2x64x256xf32>,
    return
  }
  func.func @transform_0(%arg0: i32) -> (i32, i32, i32) {
    %c0_i32 = arith.constant 0 : i32
    %c0_i32_0 = arith.constant 0 : i32
    %c0_i32_1 = arith.constant 0 : i32
    return %arg0, %c0_i32, %c0_i32_0 : i32, i32, i32
  }
  func.func @transform_1(%arg0: i32) -> (i32, i32) {
    %c0_i32 = arith.constant 0 : i32
    %c0_i32_0 = arith.constant 0 : i32
    %c0_i32_1 = arith.constant 0 : i32
    return %c0_i32, %c0_i32_0 : i32, i32
  }
  func.func @transform_2(%arg0: i32) -> (i32, i32) {
    %c0_i32 = arith.constant 0 : i32
    %c0_i32_0 = arith.constant 0 : i32
    %c0_i32_1 = arith.constant 0 : i32
    return %c0_i32, %c0_i32_0 : i32, i32
  }
  func.func @transform_3(%arg0: i32) -> (i32, i32) {
    %c0_i32 = arith.constant 0 : i32
    %c0_i32_0 = arith.constant 0 : i32
    %c0_i32_1 = arith.constant 0 : i32
    return %c0_i32, %c0_i32_0 : i32, i32
  }
  func.func @transform_4(%arg0: i32) -> (i32, i32) {
    %c0_i32 = arith.constant 0 : i32
    %c0_i32_0 = arith.constant 0 : i32
    %c0_i32_1 = arith.constant 0 : i32
    return %c0_i32, %c0_i32_0 : i32, i32
  }
  func.func @transform_5(%arg0: i32) -> (i32, i32, i32) {
    %c0_i32 = arith.constant 0 : i32
    %c0_i32_0 = arith.constant 0 : i32
    %c0_i32_1 = arith.constant 0 : i32
    return %arg0, %c0_i32, %c0_i32_0 : i32, i32, i32
  }
}

</mosaic_0001>

<bundles_post_ra>
// kernel: tpu_custom_call.1
= control target key start
LH: loop header
LB: loop body
LE: loop exit
PB: predicated region body
PF: predicated region fallthrough
CT: control target
= control target key end

     0   :  { %10 = vsyncpa [#allocation3], 0  ;;  %s1041_s0 = inlined_call_operand.hbm [shape: f32[2,64,256], index: 0, kind: input, shape index: {}]   ;;  %s1042_s1 = inlined_call_operand.vmem [shape: f32[64,4], index: 1, kind: input, shape index: {}]   ;;  %s1043_s2 = inlined_call_operand.vmem [shape: f32[1,4], index: 2, kind: input, shape index: {}]   ;;  %s1044_s3 = inlined_call_operand.vmem [shape: f32[64,4], index: 3, kind: input, shape index: {}]   ;;  %s1045_s4 = inlined_call_operand.vmem [shape: f32[64,1], index: 4, kind: input, shape index: {}]   ;;  %s1046_s5 = inlined_call_operand.hbm [shape: f32[2,64,256], index: 5, kind: output, shape index: {}]  }
   0x1   :  { %11 = vsyncpa [#allocation4], 0  ;;  %s759_s18 = smov [#allocation2]  }
   0x2   :  { %s17_s19 = sshll.u32 %s759_s18, 4  ;;  %s18_s19 = int_to_ptr.vmem [resolvable:$true] %s17_s19 }
   0x3   :  { %s723_s20 = scalar_lea.vmem %s18_s19, 4096  ;;  %p728_p1 = scmp.lt.s32.totalorder %s18_s19, %s18_s19 }
   0x4   :  { %p724_p0 = scmp.ne.s32.totalorder %s18_s19, %s723_s20  ;;  %p729_p2 = scmp.lt.s32.totalorder %s723_s20, %s723_s20 }
   0x6   :  { %p730_p3 = por %p729_p2, %p728_p1 }
   0x8   :  { %p731_p4 = pnand %p730_p3, %p724_p0 }
   0xa   :  { %734 = shalt.err (!%p731_p4)
}
   0xb   :  { %s760_s21 = smov 256   ;;  %s761_s22 = smov 16  }
   0xc   :  { %23 = dma.hbm_to_vmem [thread:$0]  %s1041_s0, 4096, %s18_s19, [#allocation3], %s760_s21, %s760_s21, %s761_s22  }
   0xd   :  { %755 = dma.done.wait [#allocation3], 4096  }
   0xe   :  { %756 = vsyncadd [#allocation3], 4294963200  ;;  %v800_v0 = vld [vmem:[#allocation2] sm:$0xff]  ;;  %v802_v1 = vld [vmem:[#allocation2 + $0x8] sm:$0xff]  ;;  %vm155_vm0 = vcmask 31744  }
   0xf   :  { %v804_v2 = vld [vmem:[#allocation2 + $0x10] sm:$0xff]  ;;  %v67_v3 = vadd.f32 %v802_v1, %v800_v0  ;;  %v808_v4 = vld [vmem:[#allocation2 + $0x18] sm:$0xff]  ;;  %v810_v5 = vld [vmem:[#allocation2 + $0x80] sm:$0xff] }
  0x10   :  { %v812_v6 = vld [vmem:[#allocation2 + $0x88] sm:$0xff]  ;;  %v816_v8 = vld [vmem:[#allocation2 + $0x90] sm:$0xff]  ;;  %v70_v9 = vadd.f32 %v808_v4, %v804_v2  ;;  %v820_v10 = vld [vmem:[#allocation2 + $0x98] sm:$0xff] }
  0x11   :  { %v91_v7 = vadd.f32 %v812_v6, %v810_v5  ;;  %68 = vadd.xlane.f32.xlu0 %v67_v3  ;;  %v822_v11 = vld [vmem:[#allocation2 + $0x20] sm:$0xff]  ;;  %v824_v12 = vld [vmem:[#allocation2 + $0x28] sm:$0xff]  ;;  %v94_v13 = vadd.f32 %v820_v10, %v816_v8  ;;  %v834_v17 = vld [vmem:[#allocation2 + $0x30] sm:$0xff] }
  0x12   :  { %v828_v14 = vld [vmem:[#allocation2 + $0xa0] sm:$0xff]  ;;  %v830_v15 = vld [vmem:[#allocation2 + $0xa8] sm:$0xff]  ;;  %v73_v16 = vadd.f32 %v824_v12, %v822_v11  ;;  %v836_v18 = vld [vmem:[#allocation2 + $0x38] sm:$0xff] }
  0x13   :  { %92 = vadd.xlane.f32.xlu1 %v91_v7  ;;  %v97_v19 = vadd.f32 %v830_v15, %v828_v14  ;;  %v840_v20 = vld [vmem:[#allocation2 + $0xb0] sm:$0xff]  ;;  %v842_v21 = vld [vmem:[#allocation2 + $0xb8] sm:$0xff]  ;;  %v76_v22 = vadd.f32 %v836_v18, %v834_v17  ;;  %v846_v23 = vld [vmem:[#allocation2 + $0x40] sm:$0xff] }
  0x14   :  { %v848_v24 = vld [vmem:[#allocation2 + $0x48] sm:$0xff]  ;;  %v100_v25 = vadd.f32 %v842_v21, %v840_v20  ;;  %v852_v26 = vld [vmem:[#allocation2 + $0xc0] sm:$0xff]  ;;  %v858_v29 = vld [vmem:[#allocation2 + $0x50] sm:$0xff] }
  0x15   :  { %71 = vadd.xlane.f32.xlu0 %v70_v9  ;;  %v854_v27 = vld [vmem:[#allocation2 + $0xc8] sm:$0xff]  ;;  %v79_v28 = vadd.f32 %v848_v24, %v846_v23  ;;  %v860_v30 = vld [vmem:[#allocation2 + $0x58] sm:$0xff]  ;;  %v864_v32 = vld [vmem:[#allocation2 + $0xd0] sm:$0xff] }
  0x16   :  { %v103_v31 = vadd.f32 %v854_v27, %v852_v26  ;;  %v866_v33 = vld [vmem:[#allocation2 + $0xd8] sm:$0xff]  ;;  %v82_v34 = vadd.f32 %v860_v30, %v858_v29  ;;  %v870_v35 = vld [vmem:[#allocation2 + $0x60] sm:$0xff]  ;;  %v872_v36 = vld [vmem:[#allocation2 + $0x68] sm:$0xff] }
  0x17   :  { %95 = vadd.xlane.f32.xlu1 %v94_v13  ;;  %v106_v37 = vadd.f32 %v866_v33, %v864_v32  ;;  %v876_v38 = vld [vmem:[#allocation2 + $0xe0] sm:$0xff]  ;;  %v878_v39 = vld [vmem:[#allocation2 + $0xe8] sm:$0xff]  ;;  %v85_v40 = vadd.f32 %v872_v36, %v870_v35  ;;  %v882_v41 = vld [vmem:[#allocation2 + $0x70] sm:$0xff] }
  0x18   :  { %v884_v42 = vld [vmem:[#allocation2 + $0x78] sm:$0xff]  ;;  %v109_v43 = vadd.f32 %v878_v39, %v876_v38  ;;  %v888_v44 = vld [vmem:[#allocation2 + $0xf0] sm:$0xff]  ;;  %v131_v51 = vld [vmem:[%s1042_s1] sm:$0xff] }
  0x19   :  { %74 = vadd.xlane.f32.xlu0 %v73_v16  ;;  %v890_v45 = vld [vmem:[#allocation2 + $0xf8] sm:$0xff]  ;;  %v88_v46 = vadd.f32 %v884_v42, %v882_v41  ;;  %v132_v56 = vld [vmem:[%s1042_s1 + $0x8] sm:$0xff]  ;;  %v133_v3 = vld [vmem:[%s1042_s1 + $0x10] sm:$0xff] }
  0x1a   :  { %v112_v47 = vadd.f32 %v890_v45, %v888_v44 }
  0x1b   :  { %98 = vadd.xlane.f32.xlu1 %v97_v19 }
  0x1d   :  { %77 = vadd.xlane.f32.xlu0 %v76_v22 }
  0x1f   :  { %101 = vadd.xlane.f32.xlu1 %v100_v25 }
  0x21   :  { %80 = vadd.xlane.f32.xlu0 %v79_v28 }
  0x23   :  { %104 = vadd.xlane.f32.xlu1 %v103_v31 }
  0x25   :  { %83 = vadd.xlane.f32.xlu0 %v82_v34  ;;  %v134_v34 = vld [vmem:[%s1042_s1 + $0x18] sm:$0xff] }
  0x27   :  { %107 = vadd.xlane.f32.xlu1 %v106_v37 }
  0x29   :  { %86 = vadd.xlane.f32.xlu0 %v85_v40 }
  0x2b   :  { %110 = vadd.xlane.f32.xlu1 %v109_v43 }
  0x2d   :  { %89 = vadd.xlane.f32.xlu0 %v88_v46 }
  0x2f   :  { %113 = vadd.xlane.f32.xlu1 %v112_v47 }
  0x9a   :  { %v69_v48 = vpop.xlane.xlu0 %68 }
  0x9b   :  { %v115_v16 = vmul.f32 0.00390625, %v69_v48  ;;  %v135_v48 = vld [vmem:[%s1042_s1 + $0x20] sm:$0xff] }
  0x9c   :  { %v93_v49 = vpop.xlane.xlu1 %92 }
  0x9d   :  { %v123_v50 = vmul.f32 0.00390625, %v93_v49  ;;  %v139_v47 = vmul.f32 %v131_v51, %v115_v16 }
  0x9e   :  { %v72_v52 = vpop.xlane.xlu0 %71 }
  0x9f   :  { %v147_v53 = vmul.f32 %v131_v51, %v123_v50  ;;  %v116_v63 = vmul.f32 0.00390625, %v72_v52 }
  0xa0   :  { %v96_v54 = vpop.xlane.xlu1 %95 }
  0xa1   :  { %v124_v55 = vmul.f32 0.00390625, %v96_v54  ;;  %v177_v57 = vsel %vm155_vm0, %v147_v53, 0.0  ;;  %v140_v31 = vmul.f32 %v132_v56, %v116_v63 }
  0xa2   :  { %v75_v58 = vpop.xlane.xlu0 %74 }
  0xa3   :  { %v148_v59 = vmul.f32 %v132_v56, %v124_v55  ;;  %v117_v19 = vmul.f32 0.00390625, %v75_v58  ;;  %v157_v55 = vsel %vm155_vm0, %v140_v31, 0.0  ;;  %v136_v58 = vld [vmem:[%s1042_s1 + $0x28] sm:$0xff] }
  0xa4   :  { %v99_v60 = vpop.xlane.xlu1 %98 }
  0xa5   :  { %v178_v61 = vsel %vm155_vm0, %v148_v59, 0.0  ;;  %v125_v62 = vmul.f32 0.00390625, %v99_v60  ;;  %v141_v49 = vmul.f32 %v133_v3, %v117_v19  ;;  %v156_v60 = vsel %vm155_vm0, %v139_v47, 0.0 }
  0xa6   :  { %v179_v7 = vadd.f32 %v178_v61, %v177_v57  ;;  %v78_v9 = vpop.xlane.xlu0 %77 }
  0xa7   :  { %v149_v13 = vmul.f32 %v133_v3, %v125_v62  ;;  %v118_v37 = vmul.f32 0.00390625, %v78_v9  ;;  %v159_v61 = vsel %vm155_vm0, %v141_v49, 0.0 }
  0xa8   :  { %v102_v22 = vpop.xlane.xlu1 %101 }
  0xa9   :  { %v180_v25 = vsel %vm155_vm0, %v149_v13, 0.0  ;;  %v126_v28 = vmul.f32 0.00390625, %v102_v22  ;;  %v142_v56 = vmul.f32 %v134_v34, %v118_v37 }
  0xaa   :  { %v181_v40 = vadd.f32 %v180_v25, %v179_v7  ;;  %v81_v43 = vpop.xlane.xlu0 %80  ;;  %v158_v7 = vadd.f32 %v157_v55, %v156_v60 }
  0xab   :  { %v150_v46 = vmul.f32 %v134_v34, %v126_v28  ;;  %v119_v50 = vmul.f32 0.00390625, %v81_v43  ;;  %v161_v16 = vsel %vm155_vm0, %v142_v56, 0.0  ;;  %v137_v28 = vld [vmem:[%s1042_s1 + $0x30] sm:$0xff] }
  0xac   :  { %v105_v52 = vpop.xlane.xlu1 %104  ;;  %v160_v25 = vadd.f32 %v159_v61, %v158_v7 }
  0xad   :  { %v182_v53 = vsel %vm155_vm0, %v150_v46, 0.0  ;;  %v127_v54 = vmul.f32 0.00390625, %v105_v52  ;;  %v143_v62 = vmul.f32 %v135_v48, %v119_v50 }
  0xae   :  { %v183_v57 = vadd.f32 %v182_v53, %v181_v40  ;;  %v84_v59 = vpop.xlane.xlu0 %83  ;;  %v162_v46 = vadd.f32 %v161_v16, %v160_v25 }
  0xaf   :  { %v151_v51 = vmul.f32 %v135_v48, %v127_v54  ;;  %v120_v63 = vmul.f32 0.00390625, %v84_v59  ;;  %v163_v37 = vsel %vm155_vm0, %v143_v62, 0.0  ;;  %v138_v54 = vld [vmem:[%s1042_s1 + $0x38] sm:$0xff] }
  0xb0   :  { %v108_v3 = vpop.xlane.xlu1 %107  ;;  %v164_v53 = vadd.f32 %v163_v37, %v162_v46 }
  0xb1   :  { %v184_v9 = vsel %vm155_vm0, %v151_v51, 0.0  ;;  %v128_v13 = vmul.f32 0.00390625, %v108_v3  ;;  %v144_v19 = vmul.f32 %v136_v58, %v120_v63 }
  0xb2   :  { %v185_v22 = vadd.f32 %v184_v9, %v183_v57  ;;  %v87_v31 = vpop.xlane.xlu0 %86 }
  0xb3   :  { %v152_v34 = vmul.f32 %v136_v58, %v128_v13  ;;  %v121_v40 = vmul.f32 0.00390625, %v87_v31  ;;  %v165_v50 = vsel %vm155_vm0, %v144_v19, 0.0 }
  0xb4   :  { %v111_v43 = vpop.xlane.xlu1 %110  ;;  %v166_v51 = vadd.f32 %v165_v50, %v164_v53  ;;  %v198_v50 = vld [vmem:[%s1043_s2] sm:$0x1] }
  0xb5   :  { %v186_v47 = vsel %vm155_vm0, %v152_v34, 0.0  ;;  %v129_v49 = vmul.f32 0.00390625, %v111_v43  ;;  %v145_v52 = vmul.f32 %v137_v28, %v121_v40  ;;  %v211_v34 = vlaneseq }
  0xb6   :  { %v187_v48 = vadd.f32 %v186_v47, %v185_v22  ;;  %v90_v55 = vpop.xlane.xlu0 %89 }
  0xb7   :  { %v153_v56 = vmul.f32 %v137_v28, %v129_v49  ;;  %v167_v57 = vsel %vm155_vm0, %v145_v52, 0.0  ;;  %v122_v58 = vmul.f32 0.00390625, %v90_v55  ;;  %v212_v47 = vshrl.u32 %v211_v34, 7 }
  0xb8   :  { %v114_v59 = vpop.xlane.xlu1 %113  ;;  %v168_v3 = vadd.f32 %v167_v57, %v166_v51  ;;  %v204_v57 = vld [vmem:[%s1044_s3 + $0x8] sm:$0xff]  ;;  %v206_v51 = vld [vmem:[%s1044_s3 + $0x18] sm:$0xff] }
  0xb9   :  { %v188_v60 = vsel %vm155_vm0, %v153_v56, 0.0  ;;  %v130_v61 = vmul.f32 0.00390625, %v114_v59  ;;  %v146_v62 = vmul.f32 %v138_v54, %v122_v58  ;;  %v213_v53 = vsub.s32 0, %v212_v47  ;;  %v203_v58 = vld [vmem:[%s1044_s3] sm:$0xff] }
  0xba   :  { %v189_v63 = vadd.f32 %v188_v60, %v187_v48  ;;  %v205_v60 = vld [vmem:[%s1044_s3 + $0x10] sm:$0xff] }
  0xbb   :  { %v154_v7 = vmul.f32 %v138_v54, %v130_v61  ;;  %v169_v9 = vsel %vm155_vm0, %v146_v62, 0.0 }
  0xbc   :  { %v170_v13 = vadd.f32 %v169_v9, %v168_v3 }
  0xbd   :  { %v190_v16 = vsel %vm155_vm0, %v154_v7, 0.0 }
  0xbe   :  { %v191_v19 = vadd.f32 %v190_v16, %v189_v63  ;;  %v171_v22 = vrot.slane %v170_v13, 4  ;;  %v208_v16 = vld [vmem:[%s1044_s3 + $0x28] sm:$0xff] }
  0xc0   :  { %v192_v25 = vrot.slane %v191_v19, 4  ;;  %v172_v28 = vadd.f32 %v171_v22, %v170_v13 }
  0xc2   :  { %v193_v31 = vadd.f32 %v192_v25, %v191_v19  ;;  %v173_v37 = vrot.slane %v172_v28, 2  ;;  %v207_v19 = vld [vmem:[%s1044_s3 + $0x20] sm:$0xff] }
  0xc4   :  { %v194_v40 = vrot.slane %v193_v31, 2  ;;  %v174_v43 = vadd.f32 %v173_v37, %v172_v28  ;;  %v210_v37 = vld [vmem:[%s1044_s3 + $0x38] sm:$0xff] }
  0xc6   :  { %v195_v46 = vadd.f32 %v194_v40, %v193_v31  ;;  %v175_v49 = vrot.slane %v174_v43, 1  ;;  %v209_v40 = vld [vmem:[%s1044_s3 + $0x30] sm:$0xff] }
  0xc8   :  { %v176_v52 = vadd.f32 %v175_v49, %v174_v43  ;;  %v196_v48 = vrot.slane %v195_v46, 1 }
  0xca   :  { %v199_v54 = vadd.f32 %v198_v50, %v176_v52  ;;  %v197_v56 = vadd.f32 %v196_v48, %v195_v46 }
  0xcc   :  { %v201_v55 = vmax.f32 %v199_v54, 0.0  ;;  %v200_v63 = vadd.f32 %v198_v50, %v197_v56 }
  0xce   :  { %v214_v59 = vrot.slane %v201_v55, %v213_v53  ;;  %v202_v22 = vmax.f32 %v200_v63, 0.0 }
  0xd0   :  { %v220_v61 = vmul.f32 %v214_v59, %v204_v57  ;;  %v219_v62 = vmul.f32 %v214_v59, %v203_v58  ;;  %v222_v9 = vmul.f32 %v214_v59, %v206_v51  ;;  %v221_v13 = vmul.f32 %v214_v59, %v205_v60 }
  0xd1   :  { %v224_v31 = vmul.f32 %v214_v59, %v208_v16  ;;  %v223_v34 = vmul.f32 %v214_v59, %v207_v19  ;;  %v218_v43 = vrot.slane %v202_v22, %v213_v53  ;;  %v226_v49 = vmul.f32 %v214_v59, %v210_v37 }
  0xd2   :  { %v238_v3 = vsel %vm155_vm0, %v220_v61, 0.0  ;;  %v235_v7 = vsel %vm155_vm0, %v219_v62, 0.0  ;;  %v244_v25 = vsel %vm155_vm0, %v222_v9, 0.0  ;;  %v241_v28 = vsel %vm155_vm0, %v221_v13, 0.0 }
  0xd3   :  { %239 = vadd.xlane.f32.xlu1 %v238_v3  ;;  %236 = vadd.xlane.f32.xlu0 %v235_v7  ;;  %v250_v46 = vsel %vm155_vm0, %v224_v31, 0.0  ;;  %v247_v47 = vsel %vm155_vm0, %v223_v34, 0.0  ;;  %v225_v50 = vmul.f32 %v214_v59, %v209_v40  ;;  %v256_v52 = vsel %vm155_vm0, %v226_v49, 0.0 }
  0xd4   :  { %v228_v54 = vmul.f32 %v218_v43, %v204_v57  ;;  %v227_v55 = vmul.f32 %v218_v43, %v203_v58  ;;  %v230_v61 = vmul.f32 %v218_v43, %v206_v51  ;;  %v229_v62 = vmul.f32 %v218_v43, %v205_v60 }
  0xd5   :  { %v253_v48 = vsel %vm155_vm0, %v225_v50, 0.0  ;;  %v232_v3 = vmul.f32 %v218_v43, %v208_v16  ;;  %v231_v7 = vmul.f32 %v218_v43, %v207_v19  ;;  %v234_v9 = vmul.f32 %v218_v43, %v210_v37  ;;  %v284_v16 = vld [vmem:[%s1045_s4 + $0x8] sm:$0xff]  ;;  %v283_v19 = vld [vmem:[%s1045_s4] sm:$0xff]  ;;  %v286_v37 = vld [vmem:[%s1045_s4 + $0x18] sm:$0xff] }
  0xd6   :  { %v262_v56 = vsel %vm155_vm0, %v228_v54, 0.0  ;;  %v259_v53 = vsel %vm155_vm0, %v227_v55, 0.0  ;;  %v268_v59 = vsel %vm155_vm0, %v230_v61, 0.0  ;;  %v265_v63 = vsel %vm155_vm0, %v229_v62, 0.0  ;;  %v287_v54 = vld [vmem:[%s1045_s4 + $0x20] sm:$0xff] }
  0xd7   :  { %245 = vadd.xlane.f32.xlu1 %v244_v25  ;;  %242 = vadd.xlane.f32.xlu0 %v241_v28  ;;  %v274_v57 = vsel %vm155_vm0, %v232_v3, 0.0  ;;  %v271_v58 = vsel %vm155_vm0, %v231_v7, 0.0  ;;  %v233_v13 = vmul.f32 %v218_v43, %v209_v40  ;;  %v280_v51 = vsel %vm155_vm0, %v234_v9, 0.0  ;;  %v285_v40 = vld [vmem:[%s1045_s4 + $0x10] sm:$0xff] }
  0xd8   :  { %v762_v22 = vmov 0   ;;  %v289_v3 = vld [vmem:[%s1045_s4 + $0x30] sm:$0xff] }
  0xd9   :  { %v277_v60 = vsel %vm155_vm0, %v233_v13, 0.0  ;;  %618 = vset.pattern.permute.xlu1 %v762_v22  ;;  %617 = vset.pattern.permute.xlu0 %v762_v22 }
  0xdb   :  { %251 = vadd.xlane.f32.xlu1 %v250_v46  ;;  %248 = vadd.xlane.f32.xlu0 %v247_v47 }
  0xdf   :  { %257 = vadd.xlane.f32.xlu1 %v256_v52  ;;  %254 = vadd.xlane.f32.xlu0 %v253_v48  ;;  %v288_v48 = vld [vmem:[%s1045_s4 + $0x28] sm:$0xff] }
  0xe3   :  { %263 = vadd.xlane.f32.xlu1 %v262_v56  ;;  %260 = vadd.xlane.f32.xlu0 %v259_v53 }
  0xe7   :  { %269 = vadd.xlane.f32.xlu1 %v268_v59  ;;  %266 = vadd.xlane.f32.xlu0 %v265_v63  ;;  %v290_v63 = vld [vmem:[%s1045_s4 + $0x38] sm:$0xff]  ;;  %s763_s4 = smov [#allocation5]  }
  0xe8   :  { %s584_s23 = sshll.u32 %s763_s4, 4  ;;  %s585_s23 = int_to_ptr.vmem [resolvable:$true] %s584_s23 }
  0xe9   :  { %s735_s2 = scalar_lea.vmem %s585_s23, 4096  ;;  %p740_p6 = scmp.lt.s32.totalorder %s585_s23, %s585_s23 }
  0xea   :  { %p736_p5 = scmp.ne.s32.totalorder %s585_s23, %s735_s2  ;;  %p741_p7 = scmp.lt.s32.totalorder %s735_s2, %s735_s2 }
  0xeb   :  { %275 = vadd.xlane.f32.xlu1 %v274_v57  ;;  %272 = vadd.xlane.f32.xlu0 %v271_v58 }
  0xec   :  { %p742_p8 = por %p741_p7, %p740_p6 }
  0xee   :  { %p743_p9 = pnand %p742_p8, %p736_p5 }
  0xef   :  { %281 = vadd.xlane.f32.xlu1 %v280_v51  ;;  %278 = vadd.xlane.f32.xlu0 %v277_v60 }
 0x15c   :  { %v240_v25 = vpop.xlane.xlu1 %239  ;;  %v237_v28 = vpop.xlane.xlu0 %236 }
 0x15d   :  { %v292_v31 = vadd.f32 %v284_v16, %v240_v25  ;;  %v291_v34 = vadd.f32 %v283_v19, %v237_v28 }
 0x15f   :  { %v597_v43 = vmul.f32 -1.442695, %v292_v31  ;;  %v596_v46 = vmul.f32 -1.442695, %v291_v34 }
 0x160   :  { %v246_v47 = vpop.xlane.xlu1 %245  ;;  %v243_v49 = vpop.xlane.xlu0 %242 }
 0x161   :  { %619 = vpow2.f32 %v597_v43  ;;  %v294_v50 = vadd.f32 %v286_v37, %v246_v47  ;;  %v293_v52 = vadd.f32 %v285_v40, %v243_v49 }
 0x162   :  { %621 = vpow2.f32 %v596_v46 }
 0x163   :  { %v599_v55 = vmul.f32 -1.442695, %v294_v50  ;;  %v598_v56 = vmul.f32 -1.442695, %v293_v52 }
 0x164   :  { %v252_v53 = vpop.xlane.xlu1 %251  ;;  %v249_v61 = vpop.xlane.xlu0 %248 }
 0x165   :  { %623 = vpow2.f32 %v599_v55  ;;  %v296_v62 = vadd.f32 %v288_v48, %v252_v53  ;;  %v295_v59 = vadd.f32 %v287_v54, %v249_v61 }
 0x166   :  { %625 = vpow2.f32 %v598_v56 }
 0x167   :  { %v601_v7 = vmul.f32 -1.442695, %v296_v62  ;;  %v600_v57 = vmul.f32 -1.442695, %v295_v59 }
 0x168   :  { %v258_v58 = vpop.xlane.xlu1 %257  ;;  %v255_v9 = vpop.xlane.xlu0 %254 }
 0x169   :  { %627 = vpow2.f32 %v601_v7  ;;  %v298_v13 = vadd.f32 %v290_v63, %v258_v58  ;;  %v297_v51 = vadd.f32 %v289_v3, %v255_v9 }
 0x16a   :  { %629 = vpow2.f32 %v600_v57 }
 0x16b   :  { %v602_v60 = vmul.f32 -1.442695, %v297_v51  ;;  %v603_v22 = vmul.f32 -1.442695, %v298_v13 }
 0x16c   :  { %v264_v25 = vpop.xlane.xlu1 %263  ;;  %v261_v28 = vpop.xlane.xlu0 %260 }
 0x16d   :  { %v300_v31 = vadd.f32 %v284_v16, %v264_v25  ;;  %v299_v34 = vadd.f32 %v283_v19, %v261_v28  ;;  %631 = vpow2.f32 %v602_v60 }
 0x16e   :  { %v620_v43 = vpop.eup %619  ;;  %633 = vpow2.f32 %v603_v22 }
 0x16f   :  { %v622_v46 = vpop.eup %621  ;;  %v356_v47 = vadd.f32 1.0, %v620_v43  ;;  %v605_v49 = vmul.f32 -1.442695, %v300_v31  ;;  %v604_v52 = vmul.f32 -1.442695, %v299_v34 }
 0x170   :  { %v355_v50 = vadd.f32 1.0, %v622_v46  ;;  %v270_v55 = vpop.xlane.xlu1 %269  ;;  %v267_v56 = vpop.xlane.xlu0 %266 }
 0x171   :  { %635 = vrcp.f32 %v356_v47  ;;  %v302_v53 = vadd.f32 %v286_v37, %v270_v55  ;;  %v301_v61 = vadd.f32 %v285_v40, %v267_v56 }
 0x172   :  { %v624_v62 = vpop.eup %623  ;;  %637 = vrcp.f32 %v355_v50 }
 0x173   :  { %v626_v59 = vpop.eup %625  ;;  %v358_v7 = vadd.f32 1.0, %v624_v62  ;;  %639 = vpow2.f32 %v605_v49  ;;  %v607_v16 = vmul.f32 -1.442695, %v302_v53  ;;  %v606_v9 = vmul.f32 -1.442695, %v301_v61 }
 0x174   :  { %v357_v19 = vadd.f32 1.0, %v626_v59  ;;  %641 = vpow2.f32 %v604_v52  ;;  %v276_v57 = vpop.xlane.xlu1 %275  ;;  %v273_v58 = vpop.xlane.xlu0 %272 }
 0x175   :  { %643 = vrcp.f32 %v358_v7  ;;  %v304_v13 = vadd.f32 %v288_v48, %v276_v57  ;;  %v303_v51 = vadd.f32 %v287_v54, %v273_v58 }
 0x176   :  { %v628_v60 = vpop.eup %627  ;;  %645 = vrcp.f32 %v357_v19 }
 0x177   :  { %v630_v22 = vpop.eup %629  ;;  %647 = vpow2.f32 %v607_v16  ;;  %v609_v37 = vmul.f32 -1.442695, %v304_v13  ;;  %v360_v40 = vadd.f32 1.0, %v628_v60  ;;  %v608_v34 = vmul.f32 -1.442695, %v303_v51 }
 0x178   :  { %v359_v25 = vadd.f32 1.0, %v630_v22  ;;  %v282_v28 = vpop.xlane.xlu1 %281  ;;  %v279_v31 = vpop.xlane.xlu0 %278  ;;  %649 = vpow2.f32 %v606_v9 }
 0x179   :  { %v306_v43 = vadd.f32 %v290_v63, %v282_v28  ;;  %v305_v46 = vadd.f32 %v289_v3, %v279_v31 }
 0x17a   :  { %651 = vrcp.f32 %v359_v25  ;;  %v632_v47 = vpop.eup %631 }
 0x17b   :  { %653 = vpow2.f32 %v609_v37  ;;  %v611_v49 = vmul.f32 -1.442695, %v306_v43  ;;  %v361_v48 = vadd.f32 1.0, %v632_v47  ;;  %v610_v54 = vmul.f32 -1.442695, %v305_v46  ;;  %v634_v50 = vpop.eup %633 }
 0x17c   :  { %655 = vrcp.f32 %v360_v40  ;;  %v362_v63 = vadd.f32 1.0, %v634_v50 }
 0x17d   :  { %657 = vpow2.f32 %v608_v34 }
 0x17e   :  { %v636_v52 = vpop.eup %635  ;;  %659 = vrcp.f32 %v361_v48 }
 0x17f   :  { %v638_v55 = vpop.eup %637  ;;  %v405_v56 = vmul.f32 1.442695, %v636_v52  ;;  %661 = vpow2.f32 %v611_v49 }
 0x180   :  { %v640_v53 = vpop.eup %639  ;;  %v403_v61 = vmul.f32 1.442695, %v638_v55  ;;  %663 = vpow2.f32 %v610_v54 }
 0x181   :  { %v642_v62 = vpop.eup %641  ;;  %665 = vpow2.f32 %v405_v56  ;;  %v364_v3 = vadd.f32 1.0, %v640_v53 }
 0x182   :  { %v644_v59 = vpop.eup %643  ;;  %667 = vpow2.f32 %v403_v61  ;;  %v363_v57 = vadd.f32 1.0, %v642_v62 }
 0x183   :  { %v646_v7 = vpop.eup %645  ;;  %669 = vrcp.f32 %v364_v3  ;;  %v409_v13 = vmul.f32 1.442695, %v644_v59 }
 0x184   :  { %v648_v16 = vpop.eup %647  ;;  %v407_v19 = vmul.f32 1.442695, %v646_v7  ;;  %671 = vrcp.f32 %v362_v63 }
 0x185   :  { %v366_v58 = vadd.f32 1.0, %v648_v16  ;;  %v650_v9 = vpop.eup %649 }
 0x186   :  { %673 = vpow2.f32 %v407_v19  ;;  %v365_v37 = vadd.f32 1.0, %v650_v9 }
 0x187   :  { %v652_v51 = vpop.eup %651  ;;  %675 = vrcp.f32 %v366_v58 }
 0x188   :  { %v654_v60 = vpop.eup %653  ;;  %677 = vrcp.f32 %v363_v57  ;;  %v411_v28 = vmul.f32 1.442695, %v652_v51 }
 0x189   :  { %v656_v22 = vpop.eup %655  ;;  %v368_v40 = vadd.f32 1.0, %v654_v60  ;;  %679 = vpow2.f32 %v409_v13 }
 0x18a   :  { %v658_v25 = vpop.eup %657  ;;  %v413_v46 = vmul.f32 1.442695, %v656_v22 }
 0x18b   :  { %v660_v31 = vpop.eup %659  ;;  %681 = vrcp.f32 %v368_v40  ;;  %v367_v48 = vadd.f32 1.0, %v658_v25 }
 0x18c   :  { %v662_v34 = vpop.eup %661  ;;  %683 = vrcp.f32 %v365_v37  ;;  %v415_v52 = vmul.f32 1.442695, %v660_v31 }
 0x18d   :  { %v664_v43 = vpop.eup %663  ;;  %v370_v47 = vadd.f32 1.0, %v662_v34  ;;  %685 = vpow2.f32 %v411_v28 }
 0x18e   :  { %v666_v49 = vpop.eup %665  ;;  %v369_v53 = vadd.f32 1.0, %v664_v43 }
 0x18f   :  { %v668_v54 = vpop.eup %667  ;;  %687 = vrcp.f32 %v370_v47  ;;  %442 = vperm.xlu1 %618, %v666_v49  }
 0x190   :  { %v670_v50 = vpop.eup %669  ;;  %437 = vperm.xlu0 %617, %v668_v54   ;;  %689 = vpow2.f32 %v413_v46 }
 0x191   :  { %v421_v55 = vmul.f32 1.442695, %v670_v50  ;;  %v672_v56 = vpop.eup %671  ;;  %691 = vrcp.f32 %v367_v48 }
 0x192   :  { %v417_v59 = vmul.f32 1.442695, %v672_v56 }
 0x193   :  { %v674_v61 = vpop.eup %673  ;;  %693 = vpow2.f32 %v421_v55 }
 0x194   :  { %v676_v62 = vpop.eup %675  ;;  %447 = vperm.xlu1 %618, %v674_v61   ;;  %695 = vpow2.f32 %v415_v52 }
 0x195   :  { %v425_v63 = vmul.f32 1.442695, %v676_v62  ;;  %v678_v3 = vpop.eup %677  ;;  %697 = vrcp.f32 %v369_v53 }
 0x196   :  { %v680_v7 = vpop.eup %679  ;;  %v419_v58 = vmul.f32 1.442695, %v678_v3 }
 0x197   :  { %699 = vpow2.f32 %v425_v63 }
 0x198   :  { %v682_v16 = vpop.eup %681  ;;  %452 = vperm.xlu1 %618, %v680_v7   ;;  %701 = vpow2.f32 %v417_v59 }
 0x199   :  { %v429_v19 = vmul.f32 1.442695, %v682_v16  ;;  %v684_v57 = vpop.eup %683 }
 0x19a   :  { %v686_v9 = vpop.eup %685  ;;  %v423_v22 = vmul.f32 1.442695, %v684_v57 }
 0x19b   :  { %703 = vpow2.f32 %v429_v19 }
 0x19c   :  { %v688_v13 = vpop.eup %687  ;;  %457 = vperm.xlu1 %618, %v686_v9   ;;  %705 = vpow2.f32 %v419_v58 }
 0x19d   :  { %v433_v51 = vmul.f32 1.442695, %v688_v13  ;;  %v690_v60 = vpop.eup %689 }
 0x19e   :  { %v692_v37 = vpop.eup %691 }
 0x19f   :  { %707 = vpow2.f32 %v433_v51  ;;  %v427_v28 = vmul.f32 1.442695, %v692_v37 }
 0x1a0   :  { %v694_v40 = vpop.eup %693  ;;  %462 = vperm.xlu1 %618, %v690_v60   ;;  %709 = vpow2.f32 %v423_v22 }
 0x1a1   :  { %482 = vperm.xlu0 %617, %v694_v40   ;;  %v696_v25 = vpop.eup %695  ;;  %711 = vpow2.f32 %v427_v28 }
 0x1a2   :  { %v698_v31 = vpop.eup %697 }
 0x1a3   :  { %v431_v43 = vmul.f32 1.442695, %v698_v31 }
 0x1a4   :  { %v700_v34 = vpop.eup %699  ;;  %467 = vperm.xlu1 %618, %v696_v25  }
 0x1a5   :  { %492 = vperm.xlu0 %617, %v700_v34   ;;  %v702_v46 = vpop.eup %701  ;;  %713 = vpow2.f32 %v431_v43 }
 0x1a8   :  { %v704_v47 = vpop.eup %703  ;;  %472 = vperm.xlu1 %618, %v702_v46  }
 0x1a9   :  { %502 = vperm.xlu0 %617, %v704_v47   ;;  %v706_v49 = vpop.eup %705 }
 0x1ac   :  { %v708_v48 = vpop.eup %707  ;;  %477 = vperm.xlu1 %618, %v706_v49  }
 0x1ad   :  { %512 = vperm.xlu0 %617, %v708_v48   ;;  %v710_v54 = vpop.eup %709 }
 0x1ae   :  { %v712_v50 = vpop.eup %711 }
 0x1b0   :  { %487 = vperm.xlu1 %618, %v710_v54  }
 0x1b2   :  { %v714_v52 = vpop.eup %713 }
 0x1b4   :  { %497 = vperm.xlu1 %618, %v712_v50  }
 0x1b8   :  { %507 = vperm.xlu1 %618, %v714_v52  }
 0x20a   :  { %v443_v55 = vpop.permute.xlu1 %442 }
 0x20b   :  { %v517_v56 = vmul.f32 %v443_v55, %v804_v2  ;;  %v518_v53 = vmul.f32 %v443_v55, %v808_v4  ;;  %v438_v61 = vpop.permute.xlu0 %437 }
 0x20c   :  { %v515_v62 = vmul.f32 %v438_v61, %v800_v0  ;;  %v516_v63 = vmul.f32 %v438_v61, %v802_v1 }
 0x20d   :  { %549 = vst [vmem:[#allocation5 + $0x10] sm:$0xff] %v517_v56  ;;  %550 = vst [vmem:[#allocation5 + $0x18] sm:$0xff] %v518_v53 }
 0x20e   :  { %547 = vst [vmem:[#allocation5] sm:$0xff] %v515_v62  ;;  %548 = vst [vmem:[#allocation5 + $0x8] sm:$0xff] %v516_v63 }
 0x20f   :  { %v448_v3 = vpop.permute.xlu1 %447 }
 0x210   :  { %v519_v59 = vmul.f32 %v448_v3, %v822_v11  ;;  %v520_v7 = vmul.f32 %v448_v3, %v824_v12 }
 0x212   :  { %551 = vst [vmem:[#allocation5 + $0x20] sm:$0xff] %v519_v59  ;;  %552 = vst [vmem:[#allocation5 + $0x28] sm:$0xff] %v520_v7 }
 0x213   :  { %v453_v16 = vpop.permute.xlu1 %452 }
 0x214   :  { %v521_v2 = vmul.f32 %v453_v16, %v834_v17  ;;  %v522_v4 = vmul.f32 %v453_v16, %v836_v18 }
 0x216   :  { %553 = vst [vmem:[#allocation5 + $0x30] sm:$0xff] %v521_v2  ;;  %554 = vst [vmem:[#allocation5 + $0x38] sm:$0xff] %v522_v4 }
 0x217   :  { %v458_v0 = vpop.permute.xlu1 %457 }
 0x218   :  { %v523_v1 = vmul.f32 %v458_v0, %v846_v23  ;;  %v524_v19 = vmul.f32 %v458_v0, %v848_v24 }
 0x21a   :  { %555 = vst [vmem:[#allocation5 + $0x40] sm:$0xff] %v523_v1  ;;  %556 = vst [vmem:[#allocation5 + $0x48] sm:$0xff] %v524_v19 }
 0x21b   :  { %v463_v57 = vpop.permute.xlu1 %462 }
 0x21c   :  { %v525_v11 = vmul.f32 %v463_v57, %v858_v29  ;;  %v526_v12 = vmul.f32 %v463_v57, %v860_v30  ;;  %v483_v58 = vpop.permute.xlu0 %482 }
 0x21d   :  { %v533_v9 = vmul.f32 %v483_v58, %v816_v8  ;;  %v534_v17 = vmul.f32 %v483_v58, %v820_v10 }
 0x21e   :  { %557 = vst [vmem:[#allocation5 + $0x50] sm:$0xff] %v525_v11  ;;  %558 = vst [vmem:[#allocation5 + $0x58] sm:$0xff] %v526_v12 }
 0x21f   :  { %565 = vst [vmem:[#allocation5 + $0x90] sm:$0xff] %v533_v9  ;;  %566 = vst [vmem:[#allocation5 + $0x98] sm:$0xff] %v534_v17  ;;  %v468_v18 = vpop.permute.xlu1 %467 }
 0x220   :  { %v527_v23 = vmul.f32 %v468_v18, %v870_v35  ;;  %v528_v24 = vmul.f32 %v468_v18, %v872_v36  ;;  %v493_v13 = vpop.permute.xlu0 %492 }
 0x221   :  { %v537_v51 = vmul.f32 %v493_v13, %v840_v20  ;;  %v538_v29 = vmul.f32 %v493_v13, %v842_v21 }
 0x222   :  { %559 = vst [vmem:[#allocation5 + $0x60] sm:$0xff] %v527_v23  ;;  %560 = vst [vmem:[#allocation5 + $0x68] sm:$0xff] %v528_v24 }
 0x223   :  { %569 = vst [vmem:[#allocation5 + $0xb0] sm:$0xff] %v537_v51  ;;  %570 = vst [vmem:[#allocation5 + $0xb8] sm:$0xff] %v538_v29  ;;  %v473_v8 = vpop.permute.xlu1 %472 }
 0x224   :  { %v529_v10 = vmul.f32 %v473_v8, %v882_v41  ;;  %v530_v30 = vmul.f32 %v473_v8, %v884_v42  ;;  %v503_v60 = vpop.permute.xlu0 %502 }
 0x225   :  { %v541_v22 = vmul.f32 %v503_v60, %v864_v32  ;;  %v542_v35 = vmul.f32 %v503_v60, %v866_v33 }
 0x226   :  { %561 = vst [vmem:[#allocation5 + $0x70] sm:$0xff] %v529_v10  ;;  %562 = vst [vmem:[#allocation5 + $0x78] sm:$0xff] %v530_v30 }
 0x227   :  { %573 = vst [vmem:[#allocation5 + $0xd0] sm:$0xff] %v541_v22  ;;  %574 = vst [vmem:[#allocation5 + $0xd8] sm:$0xff] %v542_v35  ;;  %v478_v20 = vpop.permute.xlu1 %477 }
 0x228   :  { %v531_v21 = vmul.f32 %v478_v20, %v810_v5  ;;  %v532_v36 = vmul.f32 %v478_v20, %v812_v6  ;;  %v513_v37 = vpop.permute.xlu0 %512 }
 0x229   :  { %v545_v40 = vmul.f32 %v513_v37, %v888_v44  ;;  %v546_v41 = vmul.f32 %v513_v37, %v890_v45 }
 0x22a   :  { %563 = vst [vmem:[#allocation5 + $0x80] sm:$0xff] %v531_v21  ;;  %564 = vst [vmem:[#allocation5 + $0x88] sm:$0xff] %v532_v36 }
 0x22b   :  { %577 = vst [vmem:[#allocation5 + $0xf0] sm:$0xff] %v545_v40  ;;  %578 = vst [vmem:[#allocation5 + $0xf8] sm:$0xff] %v546_v41  ;;  %v488_v32 = vpop.permute.xlu1 %487 }
 0x22c   :  { %v535_v33 = vmul.f32 %v488_v32, %v828_v14  ;;  %v536_v42 = vmul.f32 %v488_v32, %v830_v15 }
 0x22e   :  { %567 = vst [vmem:[#allocation5 + $0xa0] sm:$0xff] %v535_v33  ;;  %568 = vst [vmem:[#allocation5 + $0xa8] sm:$0xff] %v536_v42 }
 0x22f   :  { %v498_v25 = vpop.permute.xlu1 %497 }
 0x230   :  { %v539_v5 = vmul.f32 %v498_v25, %v852_v26  ;;  %v540_v6 = vmul.f32 %v498_v25, %v854_v27 }
 0x232   :  { %571 = vst [vmem:[#allocation5 + $0xc0] sm:$0xff] %v539_v5  ;;  %572 = vst [vmem:[#allocation5 + $0xc8] sm:$0xff] %v540_v6 }
 0x233   :  { %v508_v44 = vpop.permute.xlu1 %507 }
 0x234   :  { %v543_v45 = vmul.f32 %v508_v44, %v876_v38  ;;  %v544_v28 = vmul.f32 %v508_v44, %v878_v39 }
 0x236   :  { %575 = vst [vmem:[#allocation5 + $0xe0] sm:$0xff] %v543_v45  ;;  %576 = vst [vmem:[#allocation5 + $0xe8] sm:$0xff] %v544_v28 }
 0x237   :  { %746 = shalt.err (!%p743_p9)
}
 0x238   :  { %590 = dma.vmem_to_hbm [thread:$0]  %s585_s23, 4096, %s1046_s5, [#allocation4], %s760_s21, %s760_s21, %s761_s22  }
 0x239   :  { %757 = dma.done.wait [#allocation4], 4096  }
 0x23a   :  { %758 = vsyncadd [#allocation4], 4294963200 }
 0x23b   :  { %594 = vsyncpa [#allocation3], 1 }
 0x23c   :  { %595 = vsyncpa [#allocation4], 1 }

</bundles_post_ra>
